<compile_context>
chip_gen: v7x
topology: tpu7x:2x2x1
jax: 0.10.0
libtpu: 0.0.40
codegen_flags: <defaults>
</compile_context>

<pallas_src>
import functools

import jax
import jax.numpy as jnp
from jax.experimental import pallas as pl
from jax.experimental.pallas import tpu as pltpu


# ---------------------------------------------------------------------------
# Kernel
# ---------------------------------------------------------------------------
def mlp_kernel(x_ref, w2_ref, b2_ref, w3_ref, b3_ref, o_ref):
    # out = relu(l2(X))  -- bf16 matmul inputs, f32 accumulation
    x = x_ref[...].astype(jnp.bfloat16)
    h = jnp.dot(x, w2_ref[...], preferred_element_type=jnp.float32) + b2_ref[...]
    h = jnp.maximum(h, 0.0)
    # out = l3(out)
    o = jnp.dot(h.astype(jnp.bfloat16), w3_ref[...],
                preferred_element_type=jnp.float32) + b3_ref[...]
    o_ref[...] = o.astype(o_ref.dtype)


# ---------------------------------------------------------------------------
# Helpers (all-static integer math)
# ---------------------------------------------------------------------------
def _round_up(n, m):
    return ((n + m - 1) // m) * m


def _vmem_capacity_bytes():
    try:
        return int(pltpu.get_tpu_info().vmem_capacity_bytes)
    except Exception:
        return 64 << 20  # conservative (v7x per-TC VMEM)


def _vmem_bytes(tb, kp, hp, op):
    # Streaming tiles (x in f32, out in f32) are double-buffered.
    stream = 2 * (tb * kp * 4 + tb * op * 4)
    # Weights (bf16) + biases (f32) are also double-buffered by Pallas even
    # though their index_map is constant -> count them twice.
    resident = 2 * ((kp * hp + hp * op) * 2 + (hp + op) * 4)
    # In-kernel f32 intermediates + bf16 casts.
    work = tb * hp * 4 + tb * op * 4 + tb * hp * 2 + tb * kp * 2
    return stream + resident + work


def _pick_batch_tile(batch, kp, hp, op, budget):
    """Largest power-of-two batch tile (<=1024, >=8) that fits the budget and
    leaves >=2 grid steps when the batch allows (v7x dual-TC)."""
    b8 = _round_up(max(batch, 8), 8)
    cap = b8 if b8 <= 8 else _round_up(-(-b8 // 2), 8)
    tb = 1024
    while tb > 8 and (tb > cap or _vmem_bytes(tb, kp, hp, op) > budget):
        tb //= 2
    return max(8, tb)


# ---------------------------------------------------------------------------
# One-time parameter preparation (layout work OUT of the hot path)
# ---------------------------------------------------------------------------
def prepare_params(params, input_size, hidden_size, output_size, lane=128):
    """Transpose to (in, out), cast weights to bf16, reshape biases to
    (1, out) f32, zero-pad K / hidden / output dims up to multiples of `lane`.
    Done once, not per forward."""
    assert input_size == hidden_size, (
        "forward computes l2(X); only shape-valid when input_size == hidden_size"
    )
    kp = _round_up(input_size, lane)   # lane/MXU-dense contraction dim
    hp = _round_up(hidden_size, lane)
    op = _round_up(output_size, lane)

    w2_t = jnp.zeros((kp, hp), jnp.bfloat16).at[:input_size, :hidden_size].set(
        params["w2"].T.astype(jnp.bfloat16))
    b2_r = jnp.zeros((1, hp), jnp.float32).at[0, :hidden_size].set(
        params["b2"].astype(jnp.float32))
    w3_t = jnp.zeros((hp, op), jnp.bfloat16).at[:hidden_size, :output_size].set(
        params["w3"].T.astype(jnp.bfloat16))
    b3_r = jnp.zeros((1, op), jnp.float32).at[0, :output_size].set(
        params["b3"].astype(jnp.float32))

    return {"w2_t": w2_t, "b2_r": b2_r, "w3_t": w3_t, "b3_r": b3_r,
            "output_size": int(output_size)}


# ---------------------------------------------------------------------------
# Forward
# ---------------------------------------------------------------------------
@functools.partial(jax.jit, static_argnames=("out_size",))
def _mlp_forward(x, w2_t, b2_r, w3_t, b3_r, *, out_size):
    b, d_in = x.shape                 # static ints
    kp, hp = w2_t.shape               # static ints (padded)
    hp2, op = w3_t.shape
    assert hp2 == hp

    # Zero-pad x's feature (K) dim to match the lane-padded weights.
    if d_in < kp:
        x = jnp.pad(x, ((0, 0), (0, kp - d_in)))

    cap = _vmem_capacity_bytes()
    budget = cap // 2                 # target ~50% of physical VMEM
    # TODO(synk): when resident w2+w3 exceed the budget (very large hidden
    # sizes, esp. on v7x's 64 MiB VMEM), stream weight tiles over K/N grid
    # axes with an f32 accumulator instead of requiring full residency.
    tb = _pick_batch_tile(b, kp, hp, op, budget)
    n_steps = pl.cdiv(b, tb)          # partial last block handled by Pallas

    need = _vmem_bytes(tb, kp, hp, op)
    vmem_limit = max(min(int(1.5 * need) + (2 << 20), cap * 3 // 4), 16 << 20)

    out_p = pl.pallas_call(
        mlp_kernel,
        out_shape=jax.ShapeDtypeStruct((b, op), jnp.float32),
        grid=(n_steps,),
        in_specs=[
            pl.BlockSpec((tb, kp), lambda i: (i, 0)),   # x: streamed over batch
            pl.BlockSpec((kp, hp), lambda i: (0, 0)),   # w2: VMEM-resident
            pl.BlockSpec((1, hp),  lambda i: (0, 0)),   # b2: VMEM-resident
            pl.BlockSpec((hp, op), lambda i: (0, 0)),   # w3: VMEM-resident
            pl.BlockSpec((1, op),  lambda i: (0, 0)),   # b3: VMEM-resident
        ],
        out_specs=pl.BlockSpec((tb, op), lambda i: (i, 0)),
        compiler_params=pltpu.CompilerParams(
            dimension_semantics=("parallel",),
            vmem_limit_bytes=vmem_limit,
        ),
    )(x, w2_t, b2_r, w3_t, b3_r)

    # Slice away lane padding on the output features.
    return out_p[:, :out_size]


def mlp_forward(x, prep):
    return _mlp_forward(x, prep["w2_t"], prep["b2_r"], prep["w3_t"],
                        prep["b3_r"], out_size=prep["output_size"])


# ---------------------------------------------------------------------------
# Params / reference
# ---------------------------------------------------------------------------
def init_params(key, input_size, hidden_size, output_size, dtype=jnp.float32):
    ks = jax.random.split(key, 6)
    scale = 0.1
    return {
        # l1 exists in the module but is dead in the forward output.
        "w1": scale * jax.random.normal(ks[0], (hidden_size, input_size), dtype),
        "b1": scale * jax.random.normal(ks[1], (hidden_size,), dtype),
        "w2": scale * jax.random.normal(ks[2], (hidden_size, hidden_size), dtype),
        "b2": scale * jax.random.normal(ks[3], (hidden_size,), dtype),
        "w3": scale * jax.random.normal(ks[4], (output_size, hidden_size), dtype),
        "b3": scale * jax.random.normal(ks[5], (output_size,), dtype),
    }


def mlp_reference(x, params):
    # Mirrors the PyTorch forward exactly (l1/relu result is discarded).
    _ = jnp.maximum(x @ params["w1"].T + params["b1"], 0.0)
    h = jnp.maximum(x @ params["w2"].T + params["b2"], 0.0)
    return h @ params["w3"].T + params["b3"]


# ---------------------------------------------------------------------------
if __name__ == "__main__":
    key = jax.random.PRNGKey(0)
    kx, kparam = jax.random.split(key)

    batch = 8
    input_size = 32    # must equal hidden_size for l2(X) to be valid
    hidden_size = 32
    output_size = 16

    x = jax.random.normal(kx, (batch, input_size), jnp.float32)
    params = init_params(kparam, input_size, hidden_size, output_size)

    # One-time layout prep (transpose, bf16 cast, lane padding); the hot path
    # is then a pure pipelined X @ W kernel with resident weights.
    prep = prepare_params(params, input_size, hidden_size, output_size)

    out = mlp_forward(x, prep)
    out = jax.block_until_ready(out)

    ref = mlp_reference(x, params)
    assert out.shape == (batch, output_size), out.shape
    # bf16 matmul inputs with f32 accumulation -> loosened tolerance vs f32 ref.
    max_err = float(jnp.max(jnp.abs(out - ref)))
    assert jnp.allclose(out, ref, atol=2e-2, rtol=2e-2), max_err

    print("KERNEL_OK")
</pallas_src>

<mosaic_0001>
module attributes {stable_mosaic.version = 11 : i64} {
  func.func @mlp_kernel(%arg0: i32, %arg1: memref<8x128xf32, #tpu.memory_space<vmem>>, %arg2: memref<128x128xbf16, #tpu.memory_space<vmem>>, %arg3: memref<1x128xf32, #tpu.memory_space<vmem>>, %arg4: memref<128x128xbf16, #tpu.memory_space<vmem>>, %arg5: memref<1x128xf32, #tpu.memory_space<vmem>>, %arg6: memref<8x128xf32, #tpu.memory_space<vmem>>) attributes {dimension_semantics = [#tpu.dimension_semantics<parallel>], iteration_bounds = array<i64: 1>, scalar_prefetch = 0 : i64, scratch_operands = 0 : i64, tpu.core_type = #tpu.core_type<tc>, window_params = [{transform_indices = @transform_0, window_bounds = array<i64: 8, 128>}, {pipeline_mode = #tpu.pipeline_mode<synchronous>, transform_indices = @transform_1, window_bounds = array<i64: 128, 128>}, {pipeline_mode = #tpu.pipeline_mode<synchronous>, transform_indices = @transform_2, window_bounds = array<i64: 1, 128>}, {pipeline_mode = #tpu.pipeline_mode<synchronous>, transform_indices = @transform_3, window_bounds = array<i64: 128, 128>}, {pipeline_mode = #tpu.pipeline_mode<synchronous>, transform_indices = @transform_4, window_bounds = array<i64: 1, 128>}, {transform_indices = @transform_5, window_bounds = array<i64: 8, 128>}]} {
    %c0 = arith.constant 0 : index
    %c0_0 = arith.constant 0 : index
    %0 = vector.load %arg1[%c0, %c0_0] : memref<8x128xf32, #tpu.memory_space<vmem>>, vector<8x128xf32>
    %1 = arith.truncf %0 : vector<8x128xf32> to vector<8x128xbf16>
    %c0_1 = arith.constant 0 : index
    %c0_2 = arith.constant 0 : index
    %2 = vector.load %arg2[%c0_1, %c0_2] : memref<128x128xbf16, #tpu.memory_space<vmem>>, vector<128x128xbf16>
    %cst = arith.constant dense<0.000000e+00> : vector<8x128xf32>
    %3 = tpu.matmul %1, %2, %cst {dimension_numbers = #tpu.dot_dimension_numbers<[1], [0], [0], [1], [0, 0, 1, 1], [], []>} : vector<8x128xbf16>, vector<128x128xbf16>, vector<8x128xf32> -> vector<8x128xf32>
    %c0_3 = arith.constant 0 : index
    %c0_4 = arith.constant 0 : index
    %4 = vector.load %arg3[%c0_3, %c0_4] : memref<1x128xf32, #tpu.memory_space<vmem>>, vector<1x128xf32>
    %5 = vector.broadcast %4 : vector<1x128xf32> to vector<8x128xf32>
    %6 = arith.addf %3, %5 : vector<8x128xf32>
    %cst_5 = arith.constant 0.000000e+00 : f32
    %7 = vector.broadcast %cst_5 : f32 to vector<8x128xf32>
    %8 = arith.maximumf %6, %7 : vector<8x128xf32>
    %9 = arith.truncf %8 : vector<8x128xf32> to vector<8x128xbf16>
    %c0_6 = arith.constant 0 : index
    %c0_7 = arith.constant 0 : index
    %10 = vector.load %arg4[%c0_6, %c0_7] : memref<128x128xbf16, #tpu.memory_space<vmem>>, vector<128x128xbf16>
    %cst_8 = arith.constant dense<0.000000e+00> : vector<8x128xf32>
    %11 = tpu.matmul %9, %10, %cst_8 {dimension_numbers = #tpu.dot_dimension_numbers<[1], [0], [0], [1], [0, 0, 1, 1], [], []>} : vector<8x128xbf16>, vector<128x128xbf16>, vector<8x128xf32> -> vector<8x128xf32>
    %c0_9 = arith.constant 0 : index
    %c0_10 = arith.constant 0 : index
    %12 = vector.load %arg5[%c0_9, %c0_10] : memref<1x128xf32, #tpu.memory_space<vmem>>, vector<1x128xf32>
    %13 = vector.broadcast %12 : vector<1x128xf32> to vector<8x128xf32>
    %14 = arith.addf %11, %13 : vector<8x128xf32>
    %c0_11 = arith.constant 0 : index
    %c0_12 = arith.constant 0 : index
    %15 = vector.load %arg6[%c0_11, %c0_12] : memref<8x128xf32, #tpu.memory_space<vmem>>, vector<8x128xf32>
    tpu.vector_store %arg6[%c0_11, %c0_12], %14 {strides = array<i32>} : memref<8x128xf32, #tpu.memory_space<vmem>>, vector<8x128xf32>,
    return
  }
  func.func @transform_0(%arg0: i32) -> (i32, i32) {
    %c0_i32 = arith.constant 0 : i32
    %c0_i32_0 = arith.constant 0 : i32
    return %arg0, %c0_i32 : i32, i32
  }
  func.func @transform_1(%arg0: i32) -> (i32, i32) {
    %c0_i32 = arith.constant 0 : i32
    %c0_i32_0 = arith.constant 0 : i32
    %c0_i32_1 = arith.constant 0 : i32
    return %c0_i32, %c0_i32_0 : i32, i32
  }
  func.func @transform_2(%arg0: i32) -> (i32, i32) {
    %c0_i32 = arith.constant 0 : i32
    %c0_i32_0 = arith.constant 0 : i32
    %c0_i32_1 = arith.constant 0 : i32
    return %c0_i32, %c0_i32_0 : i32, i32
  }
  func.func @transform_3(%arg0: i32) -> (i32, i32) {
    %c0_i32 = arith.constant 0 : i32
    %c0_i32_0 = arith.constant 0 : i32
    %c0_i32_1 = arith.constant 0 : i32
    return %c0_i32, %c0_i32_0 : i32, i32
  }
  func.func @transform_4(%arg0: i32) -> (i32, i32) {
    %c0_i32 = arith.constant 0 : i32
    %c0_i32_0 = arith.constant 0 : i32
    %c0_i32_1 = arith.constant 0 : i32
    return %c0_i32, %c0_i32_0 : i32, i32
  }
  func.func @transform_5(%arg0: i32) -> (i32, i32) {
    %c0_i32 = arith.constant 0 : i32
    %c0_i32_0 = arith.constant 0 : i32
    return %arg0, %c0_i32 : i32, i32
  }
}

</mosaic_0001>

<bundles_post_ra>
// kernel: _mlp_forward.1
= control target key start
LH: loop header
LB: loop body
LE: loop exit
PB: predicated region body
PF: predicated region fallthrough
CT: control target
= control target key end

     0   :  { %10 = vsyncpa [#allocation3], 0  ;;  %s546_s0 = inlined_call_operand.vmem [shape: f32[8,128], index: 0, kind: input, shape index: {}]   ;;  %s547_s1 = inlined_call_operand.hbm [shape: bf16[128,128], index: 1, kind: input, shape index: {}]   ;;  %s548_s2 = inlined_call_operand.vmem [shape: f32[1,128], index: 2, kind: input, shape index: {}]   ;;  %s549_s3 = inlined_call_operand.hbm [shape: bf16[128,128], index: 3, kind: input, shape index: {}]   ;;  %s550_s4 = inlined_call_operand.vmem [shape: f32[1,128], index: 4, kind: input, shape index: {}]   ;;  %s551_s5 = inlined_call_operand.hbm [shape: f32[8,128], index: 5, kind: output, shape index: {}]  }
   0x1   :  { %11 = vsyncpa [#allocation6], 0 }
   0x2   :  { %12 = vsyncpa [#allocation4], 0  ;;  %s464_s18 = smov [#allocation2]   ;;  %s392_s22 = scalar_lea.hbm %s547_s1, 1024 }
   0x3   :  { %s20_s19 = sshll.u32 %s464_s18, 4  ;;  %p393_p0 = scmp.ne.s32.totalorder %s547_s1, %s392_s22  ;;  %s21_s19 = int_to_ptr.vmem [resolvable:$true] %s20_s19 }
   0x4   :  { %p396_p1 = scmp.lt.u32.totalorder %s392_s22, %s547_s1 }
   0x6   :  { %p398_p2 = pnand %p396_p1, %p393_p0 }
   0x8   :  { %401 = shalt.err (!%p398_p2)
}
   0x9   :  { %s402_s27 = scalar_lea.vmem %s21_s19, 1024  ;;  %p407_p4 = scmp.lt.s32.totalorder %s21_s19, %s21_s19 }
   0xa   :  { %p403_p3 = scmp.ne.s32.totalorder %s21_s19, %s402_s27  ;;  %p408_p5 = scmp.lt.s32.totalorder %s402_s27, %s402_s27 }
   0xc   :  { %p409_p6 = por %p408_p5, %p407_p4 }
   0xe   :  { %p410_p7 = pnand %p409_p6, %p403_p3 }
  0x10   :  { %413 = shalt.err (!%p410_p7)
}
  0x11   :  { %s465_s28 = smov 64   ;;  %s466_s29 = smov 4  }
  0x12   :  { %26 = dma.hbm_to_vmem [thread:$0]  %s547_s1, 1024, %s21_s19, [#allocation3], %s465_s28, %s465_s28, %s466_s29  }
  0x13   :  { %s467_s7 = smov [#allocation5]   ;;  %s414_s11 = scalar_lea.hbm %s549_s3, 1024 }
  0x14   :  { %s34_s8 = sshll.u32 %s467_s7, 4  ;;  %p415_p8 = scmp.ne.s32.totalorder %s549_s3, %s414_s11  ;;  %s35_s8 = int_to_ptr.vmem [resolvable:$true] %s34_s8 }
  0x15   :  { %p418_p9 = scmp.lt.u32.totalorder %s414_s11, %s549_s3 }
  0x17   :  { %p420_p10 = pnand %p418_p9, %p415_p8 }
  0x19   :  { %423 = shalt.err (!%p420_p10)
}
  0x1a   :  { %s424_s16 = scalar_lea.vmem %s35_s8, 1024  ;;  %p429_p12 = scmp.lt.s32.totalorder %s35_s8, %s35_s8 }
  0x1b   :  { %p425_p11 = scmp.ne.s32.totalorder %s35_s8, %s424_s16  ;;  %p430_p13 = scmp.lt.s32.totalorder %s424_s16, %s424_s16 }
  0x1d   :  { %p431_p0 = por %p430_p13, %p429_p12 }
  0x1f   :  { %p432_p1 = pnand %p431_p0, %p425_p11 }
  0x21   :  { %435 = shalt.err (!%p432_p1)
}
  0x22   :  { %40 = dma.hbm_to_vmem [thread:$0]  %s549_s3, 1024, %s35_s8, [#allocation6], %s465_s28, %s465_s28, %s466_s29  }
  0x23   :  { %458 = dma.done.wait [#allocation3], 1024  }
  0x24   :  { %459 = vsyncadd [#allocation3], 4294966272 }
  0x25   :  { %460 = dma.done.wait [#allocation6], 1024  }
  0x26   :  { %461 = vsyncadd [#allocation6], 4294966272  ;;  %v468_v0 = vmov 0.0   ;;  %vm469_vm0 = vmmov 0   ;;  %v376_v1 = vld [vmem:[#allocation2] sm:$0xff]   ;;  %v377_v2 = vld [vmem:[#allocation2 + $0x8] sm:$0xff]  }
  0x27   :  { %329 = vmatprep.subr.bf16.mxu0 %v468_v0  ;;  %345 = vmatprep.mubr.msk.bf16.mxu0 %vm469_vm0, %v468_v0  ;;  %v378_v3 = vld [vmem:[#allocation2 + $0x10] sm:$0xff]   ;;  %v384_v4 = vld [vmem:[#allocation5] sm:$0xff]   ;;  %v379_v5 = vld [vmem:[#allocation2 + $0x18] sm:$0xff]   ;;  %s470_s22 = smov [#allocation7]  }
  0x28   :  { %349 = vmatprep.subr.bf16.mxu1 %v468_v0  ;;  %365 = vmatprep.mubr.msk.bf16.mxu1 %vm469_vm0, %v468_v0  ;;  %v385_v6 = vld [vmem:[#allocation5 + $0x8] sm:$0xff]   ;;  %v380_v7 = vld [vmem:[#allocation2 + $0x20] sm:$0xff]   ;;  %v386_v8 = vld [vmem:[#allocation5 + $0x10] sm:$0xff]   ;;  %s283_s23 = sshll.u32 %s470_s22, 4  ;;  %s284_s23 = int_to_ptr.vmem [resolvable:$true] %s283_s23 }
  0x29   :  { %330 = vmatpush3.bf16.msra.mxu0 %v376_v1  ;;  %350 = vmatpush3.bf16.msra.mxu1 %v384_v4  ;;  %v381_v9 = vld [vmem:[#allocation2 + $0x28] sm:$0xff]   ;;  %v387_v10 = vld [vmem:[#allocation5 + $0x18] sm:$0xff]   ;;  %v382_v11 = vld [vmem:[#allocation2 + $0x30] sm:$0xff]   ;;  %p441_p3 = scmp.lt.s32.totalorder %s284_s23, %s284_s23 }
  0x2a   :  { %331 = vmatprep.subr.bf16.mxu0 %v468_v0  ;;  %351 = vmatprep.subr.bf16.mxu1 %v468_v0  ;;  %v388_v12 = vld [vmem:[#allocation5 + $0x20] sm:$0xff]   ;;  %v383_v13 = vld [vmem:[#allocation2 + $0x38] sm:$0xff]   ;;  %v389_v15 = vld [vmem:[#allocation5 + $0x28] sm:$0xff]  }
  0x2b   :  { %v50_v14 = vld [vmem:[%s546_s0] sm:$0xff]  ;;  %v390_v17 = vld [vmem:[#allocation5 + $0x30] sm:$0xff]  }
  0x2c   :  { %v51_v16 = vpack.c.bf16 %v50_v14, %v50_v14  ;;  %v391_v18 = vld [vmem:[#allocation5 + $0x38] sm:$0xff]  }
  0x2d   :  { %332 = vmatpush3.bf16.msra.mxu0 %v377_v2  ;;  %352 = vmatpush3.bf16.msra.mxu1 %v385_v6  ;;  %v293_v19 = vld [vmem:[%s548_s2] ss:$0 sm:$0xff]  ;;  %s436_s2 = scalar_lea.vmem %s284_s23, 128 }
  0x2e   :  { %333 = vmatprep.subr.bf16.mxu0 %v468_v0  ;;  %353 = vmatprep.subr.bf16.mxu1 %v468_v0  ;;  %v302_v27 = vld [vmem:[%s550_s4] ss:$0 sm:$0xff]  ;;  %p437_p2 = scmp.ne.s32.totalorder %s284_s23, %s436_s2  ;;  %p442_p4 = scmp.lt.s32.totalorder %s436_s2, %s436_s2 }
  0x30   :  { %p443_p5 = por %p442_p4, %p441_p3 }
  0x31   :  { %334 = vmatpush3.bf16.msra.mxu0 %v378_v3  ;;  %354 = vmatpush3.bf16.msra.mxu1 %v386_v8 }
  0x32   :  { %335 = vmatprep.subr.bf16.mxu0 %v468_v0  ;;  %355 = vmatprep.subr.bf16.mxu1 %v468_v0  ;;  %p444_p6 = pnand %p443_p5, %p437_p2 }
  0x35   :  { %336 = vmatpush3.bf16.msra.mxu0 %v379_v5  ;;  %356 = vmatpush3.bf16.msra.mxu1 %v387_v10 }
  0x36   :  { %337 = vmatprep.subr.bf16.mxu0 %v468_v0  ;;  %357 = vmatprep.subr.bf16.mxu1 %v468_v0 }
  0x39   :  { %338 = vmatpush3.bf16.msra.mxu0 %v380_v7  ;;  %358 = vmatpush3.bf16.msra.mxu1 %v388_v12 }
  0x3a   :  { %339 = vmatprep.subr.bf16.mxu0 %v468_v0  ;;  %359 = vmatprep.subr.bf16.mxu1 %v468_v0 }
  0x3d   :  { %340 = vmatpush3.bf16.msra.mxu0 %v381_v9  ;;  %360 = vmatpush3.bf16.msra.mxu1 %v389_v15 }
  0x3e   :  { %341 = vmatprep.subr.bf16.mxu0 %v468_v0  ;;  %361 = vmatprep.subr.bf16.mxu1 %v468_v0 }
  0x41   :  { %342 = vmatpush3.bf16.msra.mxu0 %v382_v11  ;;  %362 = vmatpush3.bf16.msra.mxu1 %v390_v17 }
  0x42   :  { %343 = vmatprep.subr.bf16.mxu0 %v468_v0  ;;  %363 = vmatprep.subr.bf16.mxu1 %v468_v0 }
  0x45   :  { %344 = vmatpush3.bf16.msra.mxu0 %v383_v13  ;;  %364 = vmatpush3.bf16.msra.mxu1 %v391_v18 }
  0x48   :  { %346 = vmatmul.mubr.bf16.vlgmr.msra.gmra.mrb[0].mxu0 %v51_v16 }
 0x11b   :  { %v157_v20 = vpop.f32.mrb[0].mxu0 }
 0x11c   :  { %v158_v21 = vadd.f32 %v293_v19, %v157_v20  ;;  %v347_v22 = vpop.f32.mrb[1].mxu0 }
 0x11d   :  { %v160_v23 = vpop.f32.mrb[2].mxu0 }
 0x11e   :  { %v163_v24 = vmax.f32 %v158_v21, 0.0  ;;  %v348_v25 = vpop.f32.mrb[3].mxu0 }
 0x120   :  { %v164_v26 = vpack.c.bf16 %v163_v24, %v163_v24 }
 0x122   :  { %366 = vmatmul.mubr.bf16.vlgmr.msra.gmra.mrb[0].mxu1 %v164_v26 }
 0x1f5   :  { %v270_v28 = vpop.f32.mrb[0].mxu1 }
 0x1f6   :  { %v271_v29 = vadd.f32 %v302_v27, %v270_v28  ;;  %v367_v30 = vpop.f32.mrb[1].mxu1 }
 0x1f7   :  { %v273_v31 = vpop.f32.mrb[2].mxu1 }
 0x1f8   :  { %276 = vst [vmem:[#allocation7] sm:$0xff] %v271_v29  ;;  %v368_v32 = vpop.f32.mrb[3].mxu1 }
 0x1f9   :  { %447 = shalt.err (!%p444_p6)
}
 0x1fa   :  { %s448_s4 = scalar_lea.hbm %s551_s5, 128 }
 0x1fb   :  { %p449_p7 = scmp.ne.s32.totalorder %s551_s5, %s448_s4  ;;  %p452_p8 = scmp.lt.u32.totalorder %s448_s4, %s551_s5 }
 0x1fd   :  { %p454_p9 = pnand %p452_p8, %p449_p7 }
 0x1ff   :  { %457 = shalt.err (!%p454_p9)
}
 0x200   :  { %286 = dma.vmem_to_hbm [thread:$0]  %s284_s23, 128, %s551_s5, [#allocation4]  }
 0x201   :  { %462 = dma.done.wait [#allocation4], 128  }
 0x202   :  { %463 = vsyncadd [#allocation4], 4294967168 }
 0x203   :  { %290 = vsyncpa [#allocation3], 1 }
 0x204   :  { %291 = vsyncpa [#allocation6], 1 }
 0x205   :  { %292 = vsyncpa [#allocation4], 1 }

</bundles_post_ra>
